<compile_context>
chip_gen: v5e
topology: v5e:2x2
jax: 0.10.0
libtpu: 0.0.40
codegen_flags: <defaults>
</compile_context>

<pallas_src>
import jax
import jax.numpy as jnp
from jax.experimental import pallas as pl
from jax.experimental.pallas import tpu as pltpu

LANE = 128
SUBLANE = 8
MAX_BLOCK_BYTES = 2 << 20       # 2 MiB per input block (safe on all generations)
MIN_PALLAS_ELEMENTS = 1 << 15   # below this, plain JAX is faster than a launch


def _cdiv(a, b):
    return -(-a // b)


def _round_up(a, b):
    return _cdiv(a, b) * b


def _make_mse_kernel(rows_full, blocks_per_core, block_rows, needs_mask):
    """Grid = (num_cores, blocks_per_core); axis 1 is the reduction axis."""

    def kernel(x_ref, t_ref, out_ref, acc_ref):
        k = pl.program_id(1)

        @pl.when(k == 0)
        def _():
            acc_ref[...] = jnp.zeros_like(acc_ref)

        d = x_ref[...].astype(jnp.float32) - t_ref[...].astype(jnp.float32)
        sq = d * d

        if needs_mask:
            # Zero out rows past the end of the (ragged) slab.  Pure VPU
            # compare+select, hidden under the HBM DMA.
            row0 = (pl.program_id(0) * blocks_per_core + k) * block_rows
            rid = jax.lax.broadcasted_iota(jnp.int32, sq.shape, 0)
            sq = jnp.where(row0 + rid < rows_full, sq, 0.0)

        # Leading-axis reduce of the reshaped block: pure VPU vreg adds, no XLU.
        acc_ref[...] += jnp.sum(sq.reshape(-1, SUBLANE, LANE), axis=0)

        @pl.when(k == pl.num_programs(1) - 1)
        def _():
            # Lane-dense, unmasked store of the whole accumulator; the final
            # cross-lane reduce happens once, in the JAX wrapper.
            out_ref[...] = acc_ref[...].reshape(1, SUBLANE, LANE)

    return kernel


def nst_content_loss(x, target, *, num_cores=1, use_pallas=None):
    """Returns (input_passthrough, mse_loss_scalar) — matches NSTContentLoss.forward.

    num_cores: set to 2 on v7x (2 TensorCores per chip) to shard the reduction
    with CORE_PARALLEL semantics; leave at 1 on single-TC v5e/v6e.
    """
    assert x.shape == target.shape, "input must match target shape"
    total = int(x.size)
    if total == 0:
        return x, jnp.float32(0.0)

    if use_pallas is None:
        use_pallas = total >= MIN_PALLAS_ELEMENTS

    rows_full = total // LANE
    if (not use_pallas) or rows_full == 0:
        # Small-input fallback: launch overhead dwarfs the work.
        d = x.astype(jnp.float32) - target.astype(jnp.float32)
        return x, jnp.sum(d * d) * (1.0 / float(total))

    itemsize = jnp.dtype(x.dtype).itemsize
    # Packed-sublane multiple: 8 for f32, 16 for bf16, 32 for int8/fp8.
    sublane_mult = SUBLANE * max(1, 4 // itemsize)
    max_block_rows = max(
        sublane_mult,
        (MAX_BLOCK_BYTES // (LANE * itemsize)) // sublane_mult * sublane_mult,
    )

    main_elems = rows_full * LANE
    tail_elems = total - main_elems

    x_flat = x.reshape(-1)
    t_flat = target.reshape(-1)
    if tail_elems == 0:
        # Layout-free reshape for contiguous row-major data — no HBM copy.
        xf = x_flat.reshape(rows_full, LANE)
        tf = t_flat.reshape(rows_full, LANE)
        tail_sum = jnp.float32(0.0)
    else:
        # Rare lane-ragged case: aligned prefix goes through the kernel, the
        # (<128-element) tail is reduced in plain JAX.  No full-tensor pad.
        xf = jax.lax.slice(x_flat, (0,), (main_elems,)).reshape(rows_full, LANE)
        tf = jax.lax.slice(t_flat, (0,), (main_elems,)).reshape(rows_full, LANE)
        dt = (x_flat[main_elems:].astype(jnp.float32)
              - t_flat[main_elems:].astype(jnp.float32))
        tail_sum = jnp.sum(dt * dt)

    def _tiling(nc):
        rpc = _cdiv(rows_full, nc)
        br = min(max_block_rows, _round_up(rpc, sublane_mult))
        return br, _cdiv(rpc, br)

    # Degrade the core split if there aren't enough rows to keep every block's
    # start within the slab (avoids fully-out-of-range block indices).
    while num_cores > 1:
        block_rows, blocks_per_core = _tiling(num_cores)
        if (num_cores * blocks_per_core - 1) * block_rows < rows_full:
            break
        num_cores -= 1
    if num_cores <= 1:
        num_cores = 1
        block_rows, blocks_per_core = _tiling(1)

    needs_mask = (num_cores * blocks_per_core * block_rows) != rows_full

    if num_cores > 1:
        # TODO(synk): verify in xprof on v7x that both TensorCores each stream
        # ~half the bytes under CORE_PARALLEL.
        dim_sem = (pltpu.CORE_PARALLEL, pltpu.ARBITRARY)
    else:
        dim_sem = ("arbitrary", "arbitrary")

    partials = pl.pallas_call(
        _make_mse_kernel(rows_full, blocks_per_core, block_rows, needs_mask),
        out_shape=jax.ShapeDtypeStruct((num_cores, SUBLANE, LANE), jnp.float32),
        grid_spec=pltpu.PrefetchScalarGridSpec(
            num_scalar_prefetch=0,
            grid=(num_cores, blocks_per_core),
            in_specs=[
                pl.BlockSpec((block_rows, LANE),
                             lambda p, k: (p * blocks_per_core + k, 0)),
                pl.BlockSpec((block_rows, LANE),
                             lambda p, k: (p * blocks_per_core + k, 0)),
            ],
            out_specs=pl.BlockSpec((1, SUBLANE, LANE), lambda p, k: (p, 0, 0)),
            scratch_shapes=[pltpu.VMEM((SUBLANE, LANE), jnp.float32)],
        ),
        compiler_params=pltpu.CompilerParams(dimension_semantics=dim_sem),
        cost_estimate=pl.CostEstimate(
            flops=3 * main_elems,   # sub + mul + accumulate
            transcendentals=0,
            bytes_accessed=2 * itemsize * main_elems
                           + num_cores * SUBLANE * LANE * 4,
        ),
    )(xf, tf)

    # Single cross-lane reduce + divide by the ORIGINAL element count.
    loss = (jnp.sum(partials) + tail_sum) * (1.0 / float(total))

    # forward() returns the input unchanged; the loss is the side value
    # (stands in for the stateful `self.loss` attribute).
    return x, loss


if __name__ == "__main__":
    key = jax.random.PRNGKey(0)
    k1, k2, k3, k4, k5, k6 = jax.random.split(key, 6)

    # Case 1: canonical small NCHW feature map (lane-aligned), forced Pallas.
    shape = (2, 4, 16, 16)
    x = jax.random.normal(k1, shape, dtype=jnp.float32)
    # Synthetic deterministic "target" feature map (stands in for
    # task.binded_NST.model(task.GetContentImage()).detach()).
    tgt = jax.random.normal(k2, shape, dtype=jnp.float32)
    out, loss = jax.block_until_ready(nst_content_loss(x, tgt, use_pallas=True))
    ref = jnp.mean((x - tgt) ** 2)
    assert jnp.allclose(loss, ref, rtol=1e-5, atol=1e-6), (loss, ref)
    assert jnp.array_equal(out, x)

    # Case 2: ragged element count (total % 128 != 0) exercises the in-kernel
    # row mask plus the plain-JAX lane tail.
    shape2 = (2, 8, 33, 31)
    x2 = jax.random.normal(k3, shape2, dtype=jnp.float32)
    t2 = jax.random.normal(k4, shape2, dtype=jnp.float32)
    _, loss2 = jax.block_until_ready(nst_content_loss(x2, t2, use_pallas=True))
    ref2 = jnp.mean((x2 - t2) ** 2)
    assert jnp.allclose(loss2, ref2, rtol=1e-5, atol=1e-6), (loss2, ref2)

    # Case 3: bf16 feature maps exercise the 16-row packed-sublane block path.
    shape3 = (2, 16, 16, 16)
    x3 = jax.random.normal(k5, shape3, dtype=jnp.float32).astype(jnp.bfloat16)
    t3 = jax.random.normal(k6, shape3, dtype=jnp.float32).astype(jnp.bfloat16)
    _, loss3 = jax.block_until_ready(nst_content_loss(x3, t3, use_pallas=True))
    ref3 = jnp.mean((x3.astype(jnp.float32) - t3.astype(jnp.float32)) ** 2)
    assert jnp.allclose(loss3, ref3, rtol=1e-5, atol=1e-6), (loss3, ref3)

    print("KERNEL_OK")
</pallas_src>

<mosaic_0001>
module attributes {stable_mosaic.version = 11 : i64} {
  func.func @kernel(%arg0: i32, %arg1: i32, %arg2: memref<16x128xf32, #tpu.memory_space<vmem>>, %arg3: memref<16x128xf32, #tpu.memory_space<vmem>>, %arg4: memref<1x8x128xf32, #tpu.memory_space<vmem>>, %arg5: memref<8x128xf32, #tpu.memory_space<vmem>>) attributes {dimension_semantics = [#tpu.dimension_semantics<arbitrary>, #tpu.dimension_semantics<arbitrary>], iteration_bounds = array<i64: 1, 1>, scalar_prefetch = 0 : i64, scratch_operands = 1 : i64, tpu.core_type = #tpu.core_type<tc>, window_params = [{transform_indices = @transform_0, window_bounds = array<i64: 16, 128>}, {transform_indices = @transform_1, window_bounds = array<i64: 16, 128>}, {transform_indices = @transform_2, window_bounds = array<i64: 1, 8, 128>}]} {
    %c0_i32 = arith.constant 0 : i32
    %0 = arith.cmpi eq, %arg1, %c0_i32 : i32
    %1 = arith.extui %0 : i1 to i32
    %c0_i32_0 = arith.constant 0 : i32
    %2 = arith.cmpi ne, %1, %c0_i32_0 : i32
    scf.if %2 {
      %cst_10 = arith.constant 0.000000e+00 : f32
      %15 = vector.broadcast %cst_10 : f32 to vector<8x128xf32>
      %c0_11 = arith.constant 0 : index
      %c0_12 = arith.constant 0 : index
      %16 = vector.load %arg5[%c0_11, %c0_12] : memref<8x128xf32, #tpu.memory_space<vmem>>, vector<8x128xf32>
      tpu.vector_store %arg5[%c0_11, %c0_12], %15 {strides = array<i32>} : memref<8x128xf32, #tpu.memory_space<vmem>>, vector<8x128xf32>,
    } else {
    }
    %c0 = arith.constant 0 : index
    %c0_1 = arith.constant 0 : index
    %3 = vector.load %arg2[%c0, %c0_1] : memref<16x128xf32, #tpu.memory_space<vmem>>, vector<16x128xf32>
    %c0_2 = arith.constant 0 : index
    %c0_3 = arith.constant 0 : index
    %4 = vector.load %arg3[%c0_2, %c0_3] : memref<16x128xf32, #tpu.memory_space<vmem>>, vector<16x128xf32>
    %5 = arith.subf %3, %4 : vector<16x128xf32>
    %6 = arith.mulf %5, %5 : vector<16x128xf32>
    %c0_4 = arith.constant 0 : index
    %c0_5 = arith.constant 0 : index
    %7 = vector.load %arg5[%c0_4, %c0_5] : memref<8x128xf32, #tpu.memory_space<vmem>>, vector<8x128xf32>
    %8 = vector.shape_cast %6 : vector<16x128xf32> to vector<2x8x128xf32>
    %cst = arith.constant dense<0.000000e+00> : vector<8x128xf32>
    %9 = vector.multi_reduction <add>, %8, %cst [0] : vector<2x8x128xf32> to vector<8x128xf32>
    %10 = arith.addf %7, %9 : vector<8x128xf32>
    %c0_6 = arith.constant 0 : index
    %c0_7 = arith.constant 0 : index
    %11 = vector.load %arg5[%c0_6, %c0_7] : memref<8x128xf32, #tpu.memory_space<vmem>>, vector<8x128xf32>
    tpu.vector_store %arg5[%c0_6, %c0_7], %10 {strides = array<i32>} : memref<8x128xf32, #tpu.memory_space<vmem>>, vector<8x128xf32>,
    %c0_i32_8 = arith.constant 0 : i32
    %12 = arith.cmpi eq, %arg1, %c0_i32_8 : i32
    %13 = arith.extui %12 : i1 to i32
    %c0_i32_9 = arith.constant 0 : i32
    %14 = arith.cmpi ne, %13, %c0_i32_9 : i32
    scf.if %14 {
      %c0_10 = arith.constant 0 : index
      %c0_11 = arith.constant 0 : index
      %15 = vector.load %arg5[%c0_10, %c0_11] : memref<8x128xf32, #tpu.memory_space<vmem>>, vector<8x128xf32>
      %16 = vector.shape_cast %15 : vector<8x128xf32> to vector<1x8x128xf32>
      %c0_12 = arith.constant 0 : index
      %c0_13 = arith.constant 0 : index
      %c0_14 = arith.constant 0 : index
      %17 = vector.load %arg4[%c0_12, %c0_13, %c0_14] : memref<1x8x128xf32, #tpu.memory_space<vmem>>, vector<1x8x128xf32>
      tpu.vector_store %arg4[%c0_12, %c0_13, %c0_14], %16 {strides = array<i32>} : memref<1x8x128xf32, #tpu.memory_space<vmem>>, vector<1x8x128xf32>,
    } else {
    }
    return
  }
  func.func @transform_0(%arg0: i32, %arg1: i32) -> (i32, i32) {
    %c1_i32 = arith.constant 1 : i32
    %0 = arith.muli %arg0, %c1_i32 : i32
    %1 = arith.addi %0, %arg1 : i32
    %c0_i32 = arith.constant 0 : i32
    %c0_i32_0 = arith.constant 0 : i32
    return %1, %c0_i32 : i32, i32
  }
  func.func @transform_1(%arg0: i32, %arg1: i32) -> (i32, i32) {
    %c1_i32 = arith.constant 1 : i32
    %0 = arith.muli %arg0, %c1_i32 : i32
    %1 = arith.addi %0, %arg1 : i32
    %c0_i32 = arith.constant 0 : i32
    %c0_i32_0 = arith.constant 0 : i32
    return %1, %c0_i32 : i32, i32
  }
  func.func @transform_2(%arg0: i32, %arg1: i32) -> (i32, i32, i32) {
    %c0_i32 = arith.constant 0 : i32
    %c0_i32_0 = arith.constant 0 : i32
    %c0_i32_1 = arith.constant 0 : i32
    return %arg0, %c0_i32, %c0_i32_0 : i32, i32, i32
  }
}

</mosaic_0001>

<bundles_post_ra>
// kernel: tpu_custom_call.1
= control target key start
LH: loop header
LB: loop body
LE: loop exit
PB: predicated region body
PF: predicated region fallthrough
CT: control target
= control target key end

     0   :  { %7 = vsyncpa [#allocation4], 0  ;;  %s208_s0 = inlined_call_operand.hbm [shape: f32[16,128], index: 0, kind: input, shape index: {}]   ;;  %s209_s1 = inlined_call_operand.hbm [shape: f32[16,128], index: 1, kind: input, shape index: {}]   ;;  %s210_s2 = inlined_call_operand.hbm [shape: f32[1,8,128], index: 2, kind: output, shape index: {}]  }
   0x1   :  { %8 = vsyncpa [#allocation7], 0 }
   0x2   :  { %9 = vsyncpa [#allocation5], 0  ;;  %s18_s11 = sshll.u32 %s208_s0, 4  ;;  %s179_s12 = smov [#allocation3]   ;;  %s19_s11 = int_to_ptr.hbm [resolvable:$true] %s18_s11 }
   0x3   :  { %s20_s13 = sshll.u32 %s179_s12, 4  ;;  %s35_s16 = sshll.u32 %s209_s1, 4  ;;  %s21_s13 = int_to_ptr.vmem [resolvable:$true] %s20_s13  ;;  %s36_s16 = int_to_ptr.hbm [resolvable:$true] %s35_s16 }
   0x4   :  { %s180_s17 = smov 128   ;;  %s181_s18 = smov 8  }
   0x5   :  { %26 = dma.hbm_to_vmem [thread:$0]  %s19_s11, 256, %s21_s13, [#allocation4], %s180_s17, %s180_s17, %s181_s18  }
   0x6   :  { %s182_s19 = smov [#allocation6]  }
   0x7   :  { %s37_s20 = sshll.u32 %s182_s19, 4  ;;  %s38_s20 = int_to_ptr.vmem [resolvable:$true] %s37_s20 }
   0x8   :  { %43 = dma.hbm_to_vmem [thread:$0]  %s36_s16, 256, %s38_s20, [#allocation7], %s180_s17, %s180_s17, %s181_s18  }
   0x9   :  { %173 = dma.done.wait [#allocation4], 256  }
   0xa   :  { %174 = vsyncadd [#allocation4], 4294967040 }
   0xb   :  { %175 = dma.done.wait [#allocation7], 256  }
   0xc   :  { %176 = vsyncadd [#allocation7], 4294967040  ;;  %v61_v0 = vld [vmem:[#allocation3] sm:$0xff]  ;;  %v62_v1 = vld [vmem:[#allocation3 + $0x8] sm:$0xff]  ;;  %s183_s0 = smov [#allocation8]   ;;  %s85_s23 = sshll.u32 %s210_s2, 4  ;;  %s86_s23 = int_to_ptr.hbm [resolvable:$true] %s85_s23 }
   0xd   :  { %v63_v2 = vld [vmem:[#allocation6] sm:$0xff]  ;;  %v64_v3 = vld [vmem:[#allocation6 + $0x8] sm:$0xff]  ;;  %s83_s1 = sshll.u32 %s183_s0, 4  ;;  %s84_s1 = int_to_ptr.vmem [resolvable:$true] %s83_s1 }
   0xe   :  { %v65_v4 = vsub.f32 %v61_v0, %v63_v2  ;;  %v66_v5 = vsub.f32 %v62_v1, %v64_v3 }
  0x10   :  { %v67_v6 = vmul.f32 %v65_v4, %v65_v4  ;;  %v68_v7 = vmul.f32 %v66_v5, %v66_v5 }
  0x12   :  { %v70_v8 = vadd.f32 %v68_v7, %v67_v6 }
  0x14   :  { %77 = vst [vmem:[#allocation8] sm:$0xff] %v70_v8 }
  0x15   :  { %88 = dma.vmem_to_hbm [thread:$0]  %s84_s1, 128, %s86_s23, [#allocation5]  }
  0x16   :  { %177 = dma.done.wait [#allocation5], 128  }
  0x17   :  { %178 = vsyncadd [#allocation5], 4294967168 }
  0x18   :  { %93 = vsyncpa [#allocation4], 1 }
  0x19   :  { %94 = vsyncpa [#allocation7], 1 }
  0x1a   :  { %95 = vsyncpa [#allocation5], 1 }

</bundles_post_ra>
